<compile_context>
chip_gen: v7x
topology: tpu7x:2x2x1
jax: 0.10.0
libtpu: 0.0.40
codegen_flags: <defaults>
</compile_context>

<pallas_src>
import jax
import jax.numpy as jnp
from jax import lax
from jax.experimental import pallas as pl
from jax.experimental.pallas import tpu as pltpu


def _vmem_capacity_bytes() -> int:
    """Per-core VMEM capacity, with a conservative fallback (v7x = 64 MiB)."""
    try:
        cap = getattr(pltpu.get_tpu_info(), "vmem_capacity_bytes", None)
        if cap:
            return int(cap)
    except Exception:
        pass
    return 64 * 1024 * 1024


def _make_ls_ce_kernel(eps: float, num_classes: int, n_true: int,
                       needs_row_mask: bool):
    confidence = 1.0 - eps
    w_on = confidence + eps / num_classes   # weight on the target class column
    w_off = eps / num_classes               # uniform smoothing weight elsewhere

    def kernel(x_ref, t_ref, o_ref, acc_ref):
        step = pl.program_id(0)
        nsteps = pl.num_programs(0)

        @pl.when(step == 0)
        def _init():
            acc_ref[...] = jnp.zeros_like(acc_ref)

        x = x_ref[...].astype(jnp.float32)            # (tile_n, C)
        t = t_ref[...]                                # (tile_n, 1) int32
        tn, cc = x.shape

        col = lax.broadcasted_iota(jnp.int32, (tn, cc), 1)
        # Fused class weights: confidence * onehot(target) + eps/C.
        w = jnp.where(col == t, jnp.float32(w_on), jnp.float32(w_off))

        # Numerically stable logsumexp over the class dim.
        m = jnp.max(x, axis=-1, keepdims=True)                           # (tn, 1)
        lse = jnp.log(jnp.sum(jnp.exp(x - m), axis=-1, keepdims=True)) + m

        # loss_i = confidence*nll_i + eps*smooth_i = lse_i - sum_c x_ic * w_c
        loss = lse - jnp.sum(x * w, axis=-1, keepdims=True)              # (tn, 1)

        if needs_row_mask:  # static: ragged last row tile (no batch padding done)
            row = lax.broadcasted_iota(jnp.int32, (tn, 1), 0) + step * tn
            loss = jnp.where(row < n_true, loss, 0.0)

        # Per-row partial sums stay vector-shaped; no per-step scalar reduce.
        acc_ref[...] += loss

        @pl.when(step == nsteps - 1)
        def _finalize():
            o_ref[...] = jnp.broadcast_to(jnp.sum(acc_ref[...]), o_ref.shape)

    return kernel


def label_smooth_cross_entropy(x, target, num_classes, eps=0.1, tile_n=None):
    """x: (N, C) float logits (f32 or bf16), target: (N,) int class ids -> scalar f32."""
    assert x.ndim == 2 and x.shape[1] == num_classes
    n, c = x.shape
    itemsize = jnp.dtype(x.dtype).itemsize

    vmem_cap = _vmem_capacity_bytes()
    # Scoped-VMEM limit: most of physical, capped below the 128 MiB chips' max.
    vmem_limit = max(32 * 1024 * 1024,
                     min(int(vmem_cap * 0.85), 112 * 1024 * 1024))

    if tile_n is None:
        # One logits buffer target. Total footprint is ~(2x double-buffered
        # input + ~4 f32 temporaries per element), i.e. <= ~14x this budget in
        # the worst (bf16-input) case -- still inside v7x's 64 MiB VMEM.
        logits_block_budget = min(8 * 1024 * 1024, vmem_cap // 14)
        tile_n = logits_block_budget // max(1, c * itemsize)
    tile_n = max(8, (int(tile_n) // 8) * 8)
    tile_n = min(tile_n, ((n + 7) // 8) * 8)   # never bigger than the data needs

    num_tiles = pl.cdiv(n, tile_n)
    needs_row_mask = (num_tiles * tile_n != n)

    t2d = target.astype(jnp.int32).reshape(n, 1)

    kernel = _make_ls_ce_kernel(eps, c, n, needs_row_mask)

    out = pl.pallas_call(
        kernel,
        out_shape=jax.ShapeDtypeStruct((8, 128), jnp.float32),
        grid_spec=pltpu.PrefetchScalarGridSpec(
            num_scalar_prefetch=0,
            grid=(num_tiles,),
            in_specs=[
                pl.BlockSpec((tile_n, c), lambda i: (i, 0)),   # full class dim
                pl.BlockSpec((tile_n, 1), lambda i: (i, 0)),
            ],
            out_specs=pl.BlockSpec((8, 128), lambda i: (0, 0)),
            scratch_shapes=[pltpu.VMEM((tile_n, 1), jnp.float32)],
        ),
        compiler_params=pltpu.CompilerParams(
            dimension_semantics=("arbitrary",),
            vmem_limit_bytes=vmem_limit,
        ),
        cost_estimate=pl.CostEstimate(
            flops=int(6 * n * c),
            transcendentals=int(n * c),
            bytes_accessed=int(n * c * itemsize + n * 4 + 8 * 128 * 4),
        ),
    )(x, t2d)

    return out[0, 0] / jnp.float32(n)


def _reference(x, target, eps=0.1):
    logprobs = jax.nn.log_softmax(x.astype(jnp.float32), axis=-1)
    nll = -jnp.take_along_axis(logprobs, target[:, None], axis=-1)[:, 0]
    smooth = -jnp.mean(logprobs, axis=-1)
    return jnp.mean((1.0 - eps) * nll + eps * smooth)


if __name__ == "__main__":
    key = jax.random.PRNGKey(0)
    kx, kt = jax.random.split(key)

    # Small shapes consistent with the module: batch of 8 examples, 32 classes.
    N, C = 8, 32
    x = jax.random.normal(kx, (N, C), dtype=jnp.float32)
    target = jax.random.randint(kt, (N,), 0, C, dtype=jnp.int32)
    loss = jax.block_until_ready(
        label_smooth_cross_entropy(x, target, num_classes=C, eps=0.1))
    ref = _reference(x, target, eps=0.1)
    assert jnp.allclose(loss, ref, atol=1e-5, rtol=1e-5), (loss, ref)

    # Lane-aligned class dim (C == 128), single exact tile.
    N2, C2 = 16, 128
    x2 = jax.random.normal(kx, (N2, C2), dtype=jnp.float32)
    t2 = jax.random.randint(kt, (N2,), 0, C2, dtype=jnp.int32)
    loss2 = jax.block_until_ready(
        label_smooth_cross_entropy(x2, t2, num_classes=C2, eps=0.1))
    ref2 = _reference(x2, t2, eps=0.1)
    assert jnp.allclose(loss2, ref2, atol=1e-5, rtol=1e-5), (loss2, ref2)

    # Ragged batch: exercises the cdiv grid + row-mask path (no batch padding).
    N3, C3 = 20, 32
    x3 = jax.random.normal(kx, (N3, C3), dtype=jnp.float32)
    t3 = jax.random.randint(kt, (N3,), 0, C3, dtype=jnp.int32)
    loss3 = jax.block_until_ready(
        label_smooth_cross_entropy(x3, t3, num_classes=C3, eps=0.1, tile_n=8))
    ref3 = _reference(x3, t3, eps=0.1)
    assert jnp.allclose(loss3, ref3, atol=1e-5, rtol=1e-5), (loss3, ref3)

    print("KERNEL_OK")
</pallas_src>

<mosaic_0001>
module attributes {stable_mosaic.version = 11 : i64} {
  func.func @kernel(%arg0: i32, %arg1: memref<8x32xf32, #tpu.memory_space<vmem>>, %arg2: memref<8x1xi32, #tpu.memory_space<vmem>>, %arg3: memref<8x128xf32, #tpu.memory_space<vmem>>, %arg4: memref<8x1xf32, #tpu.memory_space<vmem>>) attributes {dimension_semantics = [#tpu.dimension_semantics<arbitrary>], iteration_bounds = array<i64: 1>, scalar_prefetch = 0 : i64, scratch_operands = 1 : i64, tpu.core_type = #tpu.core_type<tc>, window_params = [{transform_indices = @transform_0, window_bounds = array<i64: 8, 32>}, {transform_indices = @transform_1, window_bounds = array<i64: 8, 1>}, {pipeline_mode = #tpu.pipeline_mode<synchronous>, transform_indices = @transform_2, window_bounds = array<i64: 8, 128>}]} {
    %c0_i32 = arith.constant 0 : i32
    %0 = arith.cmpi eq, %arg0, %c0_i32 : i32
    %1 = arith.extui %0 : i1 to i32
    %c0_i32_0 = arith.constant 0 : i32
    %2 = arith.cmpi ne, %1, %c0_i32_0 : i32
    scf.if %2 {
      %cst_14 = arith.constant 0.000000e+00 : f32
      %30 = vector.broadcast %cst_14 : f32 to vector<8x1xf32>
      %c0_15 = arith.constant 0 : index
      %c0_16 = arith.constant 0 : index
      %31 = vector.load %arg4[%c0_15, %c0_16] : memref<8x1xf32, #tpu.memory_space<vmem>>, vector<8x1xf32>
      tpu.vector_store %arg4[%c0_15, %c0_16], %30 {strides = array<i32>} : memref<8x1xf32, #tpu.memory_space<vmem>>, vector<8x1xf32>,
    } else {
    }
    %c0 = arith.constant 0 : index
    %c0_1 = arith.constant 0 : index
    %3 = vector.load %arg1[%c0, %c0_1] : memref<8x32xf32, #tpu.memory_space<vmem>>, vector<8x32xf32>
    %c0_2 = arith.constant 0 : index
    %c0_3 = arith.constant 0 : index
    %4 = vector.load %arg2[%c0_2, %c0_3] : memref<8x1xi32, #tpu.memory_space<vmem>>, vector<8x1xi32>
    %5 = tpu.iota {dimensions = array<i32: 1>} : vector<8x32xi32>
    %6 = vector.broadcast %4 : vector<8x1xi32> to vector<8x32xi32>
    %7 = arith.cmpi eq, %5, %6 : vector<8x32xi32>
    %cst = arith.constant 0.903124988 : f32
    %cst_4 = arith.constant 3.125000e-03 : f32
    %8 = vector.broadcast %cst : f32 to vector<8x32xf32>
    %9 = vector.broadcast %cst_4 : f32 to vector<8x32xf32>
    %10 = arith.select %7, %8, %9 : vector<8x32xi1>, vector<8x32xf32>
    %cst_5 = arith.constant dense<0xFF800000> : vector<8xf32>
    %11 = vector.multi_reduction <maximumf>, %3, %cst_5 [1] : vector<8x32xf32> to vector<8xf32>
    %12 = vector.shape_cast %11 : vector<8xf32> to vector<8x1xf32>
    %13 = vector.broadcast %12 : vector<8x1xf32> to vector<8x32xf32>
    %14 = arith.subf %3, %13 : vector<8x32xf32>
    %15 = math.exp %14 : vector<8x32xf32>
    %cst_6 = arith.constant dense<0.000000e+00> : vector<8xf32>
    %16 = vector.multi_reduction <add>, %15, %cst_6 [1] : vector<8x32xf32> to vector<8xf32>
    %17 = vector.shape_cast %16 : vector<8xf32> to vector<8x1xf32>
    %18 = math.log %17 : vector<8x1xf32>
    %19 = arith.addf %18, %12 : vector<8x1xf32>
    %20 = arith.mulf %3, %10 : vector<8x32xf32>
    %cst_7 = arith.constant dense<0.000000e+00> : vector<8xf32>
    %21 = vector.multi_reduction <add>, %20, %cst_7 [1] : vector<8x32xf32> to vector<8xf32>
    %22 = vector.shape_cast %21 : vector<8xf32> to vector<8x1xf32>
    %23 = arith.subf %19, %22 : vector<8x1xf32>
    %c0_8 = arith.constant 0 : index
    %c0_9 = arith.constant 0 : index
    %24 = vector.load %arg4[%c0_8, %c0_9] : memref<8x1xf32, #tpu.memory_space<vmem>>, vector<8x1xf32>
    %25 = arith.addf %24, %23 : vector<8x1xf32>
    %c0_10 = arith.constant 0 : index
    %c0_11 = arith.constant 0 : index
    %26 = vector.load %arg4[%c0_10, %c0_11] : memref<8x1xf32, #tpu.memory_space<vmem>>, vector<8x1xf32>
    tpu.vector_store %arg4[%c0_10, %c0_11], %25 {strides = array<i32>} : memref<8x1xf32, #tpu.memory_space<vmem>>, vector<8x1xf32>,
    %c0_i32_12 = arith.constant 0 : i32
    %27 = arith.cmpi eq, %arg0, %c0_i32_12 : i32
    %28 = arith.extui %27 : i1 to i32
    %c0_i32_13 = arith.constant 0 : i32
    %29 = arith.cmpi ne, %28, %c0_i32_13 : i32
    scf.if %29 {
      %c0_14 = arith.constant 0 : index
      %c0_15 = arith.constant 0 : index
      %30 = vector.load %arg4[%c0_14, %c0_15] : memref<8x1xf32, #tpu.memory_space<vmem>>, vector<8x1xf32>
      %31 = vector.shape_cast %30 : vector<8x1xf32> to vector<1x8x1xf32>
      %cst_16 = arith.constant dense<0.000000e+00> : vector<1xf32>
      %32 = vector.multi_reduction <add>, %31, %cst_16 [1, 2] : vector<1x8x1xf32> to vector<1xf32>
      %33 = vector.shape_cast %32 : vector<1xf32> to vector<1x1x1xf32>
      %34 = vector.extract %33[0, 0, 0] : f32 from vector<1x1x1xf32>
      %35 = vector.broadcast %34 : f32 to vector<8x128xf32>
      %c0_17 = arith.constant 0 : index
      %c0_18 = arith.constant 0 : index
      %36 = vector.load %arg3[%c0_17, %c0_18] : memref<8x128xf32, #tpu.memory_space<vmem>>, vector<8x128xf32>
      tpu.vector_store %arg3[%c0_17, %c0_18], %35 {strides = array<i32>} : memref<8x128xf32, #tpu.memory_space<vmem>>, vector<8x128xf32>,
    } else {
    }
    return
  }
  func.func @transform_0(%arg0: i32) -> (i32, i32) {
    %c0_i32 = arith.constant 0 : i32
    %c0_i32_0 = arith.constant 0 : i32
    return %arg0, %c0_i32 : i32, i32
  }
  func.func @transform_1(%arg0: i32) -> (i32, i32) {
    %c0_i32 = arith.constant 0 : i32
    %c0_i32_0 = arith.constant 0 : i32
    return %arg0, %c0_i32 : i32, i32
  }
  func.func @transform_2(%arg0: i32) -> (i32, i32) {
    %c0_i32 = arith.constant 0 : i32
    %c0_i32_0 = arith.constant 0 : i32
    %c0_i32_1 = arith.constant 0 : i32
    return %c0_i32, %c0_i32_0 : i32, i32
  }
}

</mosaic_0001>

<bundles_post_ra>
// kernel: tpu_custom_call.1
= control target key start
LH: loop header
LB: loop body
LE: loop exit
PB: predicated region body
PF: predicated region fallthrough
CT: control target
= control target key end

     0   :  { %vm27_vm0 = vcmask 261120   ;;  %s154_s0 = inlined_call_operand.vmem [shape: f32[8,32], index: 0, kind: input, shape index: {}]   ;;  %s155_s1 = inlined_call_operand.vmem [shape: s32[8,1], index: 1, kind: input, shape index: {}]   ;;  %s156_s2 = inlined_call_operand.hbm [shape: f32[8,128], index: 2, kind: output, shape index: {}]  }
   0x1   :  { %v18_v0 = vld [vmem:[%s154_s0] sm:$0xff] }
   0x2   :  { %7 = vsyncpa [#allocation4], 0  ;;  %v28_v1 = vsel %vm27_vm0, %v18_v0, -inf  ;;  %v114_v2 = vmov 0   ;;  %v19_v3 = vld [vmem:[%s155_s1] sm:$0xff]  ;;  %v20_v6 = vlaneseq  ;;  %vm16_vm2 = vcmask 7168  }
   0x3   :  { %85 = vset.pattern.permute.xlu0 %v114_v2  ;;  %v115_v10 = vmov 0.003125   ;;  %v116_v16 = vmov 0.0   ;;  %s117_s0 = smov [#allocation3]  }
   0x4   :  { %29 = vmax.xlane.f32.xlu0 %v28_v1  ;;  %v21_v8 = vand.u32 127, %v20_v6  ;;  %17 = vst.msk [vmem:[#allocation2] sm:$0xff] %vm16_vm2, %v116_v16  ;;  %s71_s1 = sshll.u32 %s117_s0, 4  ;;  %s72_s1 = int_to_ptr.vmem [resolvable:$true] %s71_s1 }
   0x5   :  { %s90_s14 = scalar_lea.vmem %s72_s1, 128  ;;  %p95_p1 = scmp.lt.s32.totalorder %s72_s1, %s72_s1 }
   0x6   :  { %p91_p0 = scmp.ne.s32.totalorder %s72_s1, %s90_s14  ;;  %p96_p2 = scmp.lt.s32.totalorder %s90_s14, %s90_s14 }
   0x8   :  { %p97_p3 = por %p96_p2, %p95_p1 }
   0xa   :  { %p98_p4 = pnand %p97_p3, %p91_p0 }
   0xb   :  { %v45_v22 = vld [vmem:[#allocation2] sm:$0xff] }
  0x1a   :  { %23 = vperm.xlu0 %85, %v19_v3  }
  0x91   :  { %v30_v4 = vpop.xlane.xlu0 %29 }
  0x92   :  { %v31_v5 = vsub.f32 %v18_v0, %v30_v4 }
  0x94   :  { %v32_v7 = vmul.f32 1.442695, %v31_v5 }
  0x96   :  { %86 = vpow2.f32 %v32_v7 }
  0x99   :  { %v24_v9 = vpop.permute.xlu0 %23 }
  0x9a   :  { %vm25_vm1 = vcmp.eq.s32.totalorder %v21_v8, %v24_v9 }
  0x9b   :  { %v26_v11 = vsel %vm25_vm1, 0.903125, %v115_v10 }
  0x9c   :  { %v40_v12 = vmul.f32 %v26_v11, %v18_v0 }
  0x9e   :  { %v41_v15 = vsel %vm27_vm0, %v40_v12, 0.0 }
  0xa0   :  { %v87_v13 = vpop.eup %86 }
  0xa1   :  { %v34_v14 = vsel %vm27_vm0, %v87_v13, 0.0 }
  0xa2   :  { %35 = vadd.xlane.f32.xlu1 %v34_v14 }
  0xa6   :  { %42 = vadd.xlane.f32.xlu1 %v41_v15 }
 0x12f   :  { %v36_v17 = vpop.xlane.xlu1 %35 }
 0x130   :  { %88 = vlog2.f32 %v36_v17 }
 0x133   :  { %v43_v20 = vpop.xlane.xlu1 %42 }
 0x13a   :  { %v89_v18 = vpop.eup %88 }
 0x13b   :  { %v38_v19 = vmul.f32 0.6931472, %v89_v18 }
 0x13d   :  { %v39_v21 = vadd.f32 %v38_v19, %v30_v4 }
 0x13f   :  { %v44_v23 = vsub.f32 %v39_v21, %v43_v20 }
 0x141   :  { %v46_v24 = vadd.f32 %v45_v22, %v44_v23 }
 0x143   :  { %48 = vst.msk [vmem:[#allocation2] sm:$0xff] %vm16_vm2, %v46_v24 }
 0x14a   :  { %v52_v25 = vld [vmem:[#allocation2] sm:$0xff] }
 0x14b   :  { %v53_v26 = vsel %vm16_vm2, %v52_v25, 0.0 }
 0x14c   :  { %54 = vadd.xlane.f32.xlu1 %v53_v26 }
 0x1d9   :  { %v55_v27 = vpop.xlane.xlu1 %54 }
 0x1da   :  { %v56_v28 = vrot.slane %v55_v27, 4 }
 0x1dc   :  { %v57_v29 = vadd.f32 %v56_v28, %v55_v27 }
 0x1de   :  { %v58_v30 = vrot.slane %v57_v29, 2 }
 0x1e0   :  { %v59_v31 = vadd.f32 %v58_v30, %v57_v29 }
 0x1e2   :  { %v60_v32 = vrot.slane %v59_v31, 1 }
 0x1e4   :  { %v61_v33 = vadd.f32 %v60_v32, %v59_v31 }
 0x1e6   :  { %79 = vpush %v61_v33 }
 0x217   :  { %s80_s13 = spop %79 }
 0x218   :  { %v63_v34 = vstv %s80_s13 }
 0x219   :  { %64 = vst [vmem:[#allocation3] sm:$0xff] %v63_v34 }
 0x21a   :  { %101 = shalt.err (!%p98_p4)
}
 0x21b   :  { %s102_s17 = scalar_lea.hbm %s156_s2, 128 }
 0x21c   :  { %p103_p5 = scmp.ne.s32.totalorder %s156_s2, %s102_s17  ;;  %p106_p6 = scmp.lt.u32.totalorder %s102_s17, %s156_s2 }
 0x21e   :  { %p108_p7 = pnand %p106_p6, %p103_p5 }
 0x220   :  { %111 = shalt.err (!%p108_p7)
}
 0x221   :  { %74 = dma.vmem_to_hbm [thread:$0]  %s72_s1, 128, %s156_s2, [#allocation4]  }
 0x222   :  { %112 = dma.done.wait [#allocation4], 128  }
 0x223   :  { %113 = vsyncadd [#allocation4], 4294967168 }
 0x224   :  { %78 = vsyncpa [#allocation4], 1 }

</bundles_post_ra>
